<compile_context>
chip_gen: v7x
topology: tpu7x:2x2x1
jax: 0.10.0
libtpu: 0.0.40
codegen_flags: <defaults>
</compile_context>

<pallas_src>
import math
import functools

import jax
import jax.numpy as jnp
from jax.experimental import pallas as pl
from jax.experimental.pallas import tpu as pltpu


def _build_pe_table(seq_len: int, d_model: int) -> jnp.ndarray:
    """Sinusoidal PE buffer, identical to the PyTorch __init__."""
    position = jnp.arange(seq_len, dtype=jnp.float32)[:, None]            # (S, 1)
    div_term = jnp.exp(
        jnp.arange(0, d_model, 2, dtype=jnp.float32)
        * (-math.log(10000.0) / d_model)
    )                                                                     # (D/2,)
    pe = jnp.zeros((seq_len, d_model), dtype=jnp.float32)
    pe = pe.at[:, 0::2].set(jnp.sin(position * div_term))
    pe = pe.at[:, 1::2].set(jnp.cos(position * div_term))
    return pe                                                             # (S, D)


# ---------------------------------------------------------------------------
# Kernels (2-D, lane-dense blocks)
# ---------------------------------------------------------------------------

def _pe_add_kernel(x_ref, pe_ref, o_ref):
    # x_ref: (R, TC), pe_ref: (1, TC) broadcast over rows
    o_ref[...] = (x_ref[...] + pe_ref[...]).astype(o_ref.dtype)


def _pe_add_dropout_kernel(x_ref, pe_ref, bits_ref, o_ref, *,
                           threshold: int, scale: float):
    y = x_ref[...] + pe_ref[...]
    keep = bits_ref[...] >= jnp.uint32(threshold)        # integer compare only
    o_ref[...] = jnp.where(keep, y * jnp.float32(scale),
                           jnp.zeros_like(y)).astype(o_ref.dtype)


# ---------------------------------------------------------------------------
# Wrapper
# ---------------------------------------------------------------------------

def _pick_tiles(B: int, L: int):
    """Pick (row_tile, col_tile) for the flattened (B, L) view."""
    # Row tile: multiple of 8, or the full batch dim if that is not possible.
    if B % 8 == 0:
        row = min(B, 64)
    else:
        row = B
    # Column tile: lane-dense multiple of 128, sized so one buffer stays
    # around ~2 MiB (fits comfortably under every generation's VMEM budget
    # with double-buffered x / bits / out).
    target_elems = 1 << 19                       # ~2 MiB per f32 buffer
    if L % 128 == 0:
        col = min(L, max(128, (target_elems // max(row, 1)) // 128 * 128))
    else:
        col = L                                  # fall back to a full-row block
    return row, col


def positional_encoding_forward(x: jnp.ndarray, pe: jnp.ndarray, *,
                                dropout_p: float, training: bool = True,
                                rng_key=None):
    """x: (B, S, D); pe: (S_max, D) with S <= S_max."""
    B, S, D = x.shape
    L = S * D
    x2 = x.reshape(B, L)
    pe2 = pe[:S, :].reshape(1, L).astype(x.dtype)

    row, col = _pick_tiles(B, L)
    grid = (pl.cdiv(L, col), pl.cdiv(B, row))    # batch/row axis innermost

    x_spec = pl.BlockSpec((row, col), lambda c, r: (r, c))
    pe_spec = pl.BlockSpec((1, col), lambda c, r: (0, c))   # resident across r
    out_spec = pl.BlockSpec((row, col), lambda c, r: (r, c))

    compiler_params = pltpu.CompilerParams(
        dimension_semantics=("parallel", "parallel"),
        vmem_limit_bytes=32 << 20,
    )

    use_dropout = training and dropout_p > 0.0
    if use_dropout:
        if rng_key is None:
            rng_key = jax.random.PRNGKey(0)
        bits = jax.random.bits(rng_key, (B, L), dtype=jnp.uint32)
        threshold = int(round(dropout_p * float(1 << 32)))
        scale = 1.0 / (1.0 - dropout_p)
        kernel = functools.partial(_pe_add_dropout_kernel,
                                   threshold=threshold, scale=scale)
        out2 = pl.pallas_call(
            kernel,
            out_shape=jax.ShapeDtypeStruct((B, L), x.dtype),
            grid=grid,
            in_specs=[x_spec, pe_spec, x_spec],
            out_specs=out_spec,
            compiler_params=compiler_params,
        )(x2, pe2, bits)
    else:
        out2 = pl.pallas_call(
            _pe_add_kernel,
            out_shape=jax.ShapeDtypeStruct((B, L), x.dtype),
            grid=grid,
            in_specs=[x_spec, pe_spec],
            out_specs=out_spec,
            compiler_params=compiler_params,
        )(x2, pe2)

    return out2.reshape(B, S, D)


# ---------------------------------------------------------------------------
# Demo / self-check
# ---------------------------------------------------------------------------

if __name__ == "__main__":
    # Small shapes consistent with the module: batch=2, seq=8, d_model=32
    B, S, D = 2, 8, 32
    dropout_p = 0.1
    seq_len_max = 16          # module's PE buffer can be longer than x's seq

    key = jax.random.PRNGKey(0)
    kx, kd = jax.random.split(key)
    x = jax.random.normal(kx, (B, S, D), dtype=jnp.float32)
    pe = _build_pe_table(seq_len_max, D)

    # Training path (dropout active)
    out_train = positional_encoding_forward(
        x, pe, dropout_p=dropout_p, training=True, rng_key=kd)
    out_train = jax.block_until_ready(out_train)

    # Eval path (dropout off) vs pure-JAX reference
    out_eval = jax.block_until_ready(
        positional_encoding_forward(x, pe, dropout_p=dropout_p, training=False))
    ref = x + pe[:S, :][None, :, :]

    assert out_train.shape == (B, S, D)
    assert jnp.allclose(out_eval, ref, atol=1e-6), "PE add mismatch"

    # Every training output element must be 0 (dropped) or (x+pe)/(1-p) (kept).
    scale = 1.0 / (1.0 - dropout_p)
    ok = jnp.isclose(out_train, 0.0, atol=1e-6) | jnp.isclose(
        out_train, ref * scale, atol=1e-5)
    assert bool(jnp.all(ok)), "dropout semantics mismatch"

    print("KERNEL_OK")
</pallas_src>

<mosaic_0001>
module attributes {stable_mosaic.version = 11 : i64} {
  func.func @_pe_add_dropout_kernel(%arg0: i32, %arg1: i32, %arg2: memref<2x256xf32, #tpu.memory_space<vmem>>, %arg3: memref<1x256xf32, #tpu.memory_space<vmem>>, %arg4: memref<2x256xi32, #tpu.memory_space<vmem>>, %arg5: memref<2x256xf32, #tpu.memory_space<vmem>>) attributes {dimension_semantics = [#tpu.dimension_semantics<parallel>, #tpu.dimension_semantics<parallel>], iteration_bounds = array<i64: 1, 1>, scalar_prefetch = 0 : i64, scratch_operands = 0 : i64, tpu.core_type = #tpu.core_type<tc>, window_params = [{transform_indices = @transform_0, window_bounds = array<i64: 2, 256>}, {transform_indices = @transform_1, window_bounds = array<i64: 1, 256>}, {transform_indices = @transform_2, window_bounds = array<i64: 2, 256>}, {transform_indices = @transform_3, window_bounds = array<i64: 2, 256>}]} {
    %c0 = arith.constant 0 : index
    %c0_0 = arith.constant 0 : index
    %0 = vector.load %arg2[%c0, %c0_0] : memref<2x256xf32, #tpu.memory_space<vmem>>, vector<2x256xf32>
    %c0_1 = arith.constant 0 : index
    %c0_2 = arith.constant 0 : index
    %1 = vector.load %arg3[%c0_1, %c0_2] : memref<1x256xf32, #tpu.memory_space<vmem>>, vector<1x256xf32>
    %2 = vector.broadcast %1 : vector<1x256xf32> to vector<2x256xf32>
    %3 = arith.addf %0, %2 : vector<2x256xf32>
    %c0_3 = arith.constant 0 : index
    %c0_4 = arith.constant 0 : index
    %4 = vector.load %arg4[%c0_3, %c0_4] : memref<2x256xi32, #tpu.memory_space<vmem>>, vector<2x256xi32>
    %c429496730_i32 = arith.constant 429496730 : i32
    %5 = vector.broadcast %c429496730_i32 : i32 to vector<2x256xi32>
    %6 = arith.cmpi uge, %4, %5 : vector<2x256xi32>
    %cst = arith.constant 1.11111116 : f32
    %7 = vector.broadcast %cst : f32 to vector<2x256xf32>
    %8 = arith.mulf %3, %7 : vector<2x256xf32>
    %cst_5 = arith.constant 0.000000e+00 : f32
    %9 = vector.broadcast %cst_5 : f32 to vector<2x256xf32>
    %10 = arith.select %6, %8, %9 : vector<2x256xi1>, vector<2x256xf32>
    %c0_6 = arith.constant 0 : index
    %c0_7 = arith.constant 0 : index
    %11 = vector.load %arg5[%c0_6, %c0_7] : memref<2x256xf32, #tpu.memory_space<vmem>>, vector<2x256xf32>
    tpu.vector_store %arg5[%c0_6, %c0_7], %10 {strides = array<i32>} : memref<2x256xf32, #tpu.memory_space<vmem>>, vector<2x256xf32>,
    return
  }
  func.func @transform_0(%arg0: i32, %arg1: i32) -> (i32, i32) {
    %c0_i32 = arith.constant 0 : i32
    return %arg1, %arg0 : i32, i32
  }
  func.func @transform_1(%arg0: i32, %arg1: i32) -> (i32, i32) {
    %c0_i32 = arith.constant 0 : i32
    %c0_i32_0 = arith.constant 0 : i32
    return %c0_i32, %arg0 : i32, i32
  }
  func.func @transform_2(%arg0: i32, %arg1: i32) -> (i32, i32) {
    %c0_i32 = arith.constant 0 : i32
    return %arg1, %arg0 : i32, i32
  }
  func.func @transform_3(%arg0: i32, %arg1: i32) -> (i32, i32) {
    %c0_i32 = arith.constant 0 : i32
    return %arg1, %arg0 : i32, i32
  }
}

</mosaic_0001>

<bundles_post_ra>
// kernel: tpu_custom_call.1
= control target key start
LH: loop header
LB: loop body
LE: loop exit
PB: predicated region body
PF: predicated region fallthrough
CT: control target
= control target key end

     0   :  { %8 = vsyncpa [#allocation3], 0  ;;  %s172_s0 = inlined_call_operand.hbm [shape: f32[2,256], index: 0, kind: input, shape index: {}]   ;;  %s173_s1 = inlined_call_operand.vmem [shape: f32[1,256], index: 1, kind: input, shape index: {}]   ;;  %s174_s2 = inlined_call_operand.vmem [shape: u32[2,256], index: 2, kind: input, shape index: {}]   ;;  %s175_s3 = inlined_call_operand.hbm [shape: f32[2,256], index: 3, kind: output, shape index: {}]  }
   0x1   :  { %9 = vsyncpa [#allocation4], 0  ;;  %s119_s12 = smov [#allocation2]   ;;  %s71_s16 = scalar_lea.hbm %s172_s0, 64 }
   0x2   :  { %s16_s13 = sshll.u32 %s119_s12, 4  ;;  %p72_p0 = scmp.ne.s32.totalorder %s172_s0, %s71_s16  ;;  %s17_s13 = int_to_ptr.vmem [resolvable:$true] %s16_s13 }
   0x3   :  { %p75_p1 = scmp.lt.u32.totalorder %s71_s16, %s172_s0 }
   0x5   :  { %p77_p2 = pnand %p75_p1, %p72_p0 }
   0x7   :  { %80 = shalt.err (!%p77_p2)
}
   0x8   :  { %s81_s21 = scalar_lea.vmem %s17_s13, 64  ;;  %p86_p4 = scmp.lt.s32.totalorder %s17_s13, %s17_s13 }
   0x9   :  { %p82_p3 = scmp.ne.s32.totalorder %s17_s13, %s81_s21  ;;  %p87_p5 = scmp.lt.s32.totalorder %s81_s21, %s81_s21 }
   0xb   :  { %p88_p6 = por %p87_p5, %p86_p4 }
   0xd   :  { %p89_p7 = pnand %p88_p6, %p82_p3 }
   0xf   :  { %92 = shalt.err (!%p89_p7)
}
  0x10   :  { %19 = dma.hbm_to_vmem [thread:$0]  %s172_s0, 64, %s17_s13, [#allocation3]  }
  0x11   :  { %115 = dma.done.wait [#allocation3], 64  }
  0x12   :  { %116 = vsyncadd [#allocation3], 4294967232  ;;  %v30_v0 = vlaneseq  ;;  %v120_v1 = vmov 1983009808   ;;  %v28_v7 = vld [vmem:[%s173_s1] sm:$0x3] }
  0x13   :  { %v40_v2 = vunpack.c.l.s4 %v120_v1  ;;  %v27_v12 = vld [vmem:[#allocation2] sm:$0xf]  ;;  %s121_s27 = smov [#allocation5]  }
  0x14   :  { %v31_v3 = vshrl.u32 %v30_v0, 7  ;;  %v48_v14 = vld [vmem:[%s174_s2] sm:$0xf]  ;;  %s59_s28 = sshll.u32 %s121_s27, 4  ;;  %s60_s28 = int_to_ptr.vmem [resolvable:$true] %s59_s28 }
  0x15   :  { %v41_v6 = vunpack.c.0.s8 %v40_v2  ;;  %vm49_vm0 = vcmp.ge.u32.totalorder %v48_v14, 429496730  ;;  %s93_s29 = scalar_lea.vmem %s60_s28, 64  ;;  %p98_p9 = scmp.lt.s32.totalorder %s60_s28, %s60_s28 }
  0x16   :  { %v32_v4 = vsub.s32 0, %v31_v3  ;;  %v36_v5 = vsub.s32 1, %v31_v3  ;;  %p94_p8 = scmp.ne.s32.totalorder %s60_s28, %s93_s29  ;;  %p99_p10 = scmp.lt.s32.totalorder %s93_s29, %s93_s29 }
  0x17   :  { %v44_v10 = vsub.s32 %v41_v6, %v31_v3 }
  0x18   :  { %v33_v8 = vrot.slane %v28_v7, %v32_v4  ;;  %v37_v9 = vrot.slane %v28_v7, %v36_v5  ;;  %p100_p11 = por %p99_p10, %p98_p9 }
  0x1a   :  { %v38_v11 = vcombine.low %v33_v8, %v37_v9  ;;  %p101_p12 = pnand %p100_p11, %p94_p8 }
  0x1c   :  { %v45_v13 = vrot.slane %v38_v11, %v44_v10 }
  0x1e   :  { %v47_v15 = vadd.f32 %v45_v13, %v27_v12 }
  0x20   :  { %v50_v16 = vmul.f32 1.1111112, %v47_v15 }
  0x22   :  { %v51_v17 = vsel %vm49_vm0, %v50_v16, 0.0 }
  0x23   :  { %52 = vst [vmem:[#allocation5] sm:$0xf] %v51_v17 }
  0x24   :  { %104 = shalt.err (!%p101_p12)
}
  0x25   :  { %s105_s4 = scalar_lea.hbm %s175_s3, 64 }
  0x26   :  { %p106_p13 = scmp.ne.s32.totalorder %s175_s3, %s105_s4  ;;  %p109_p0 = scmp.lt.u32.totalorder %s105_s4, %s175_s3 }
  0x28   :  { %p111_p1 = pnand %p109_p0, %p106_p13 }
  0x2a   :  { %114 = shalt.err (!%p111_p1)
}
  0x2b   :  { %62 = dma.vmem_to_hbm [thread:$0]  %s60_s28, 64, %s175_s3, [#allocation4]  }
  0x2c   :  { %117 = dma.done.wait [#allocation4], 64  }
  0x2d   :  { %118 = vsyncadd [#allocation4], 4294967232 }
  0x2e   :  { %66 = vsyncpa [#allocation3], 1 }
  0x2f   :  { %67 = vsyncpa [#allocation4], 1 }

</bundles_post_ra>
